<compile_context>
chip_gen: v5e
topology: v5e:2x2
jax: 0.10.0
libtpu: 0.0.40
codegen_flags: <defaults>
</compile_context>

<pallas_src>
import functools

import jax
import jax.numpy as jnp
from jax import lax
from jax.experimental import pallas as pl
from jax.experimental.pallas import tpu as pltpu


def _layernorm(x, gamma, beta, eps=1e-5):
    # PyTorch nn.LayerNorm: biased variance over the last dim, eps inside sqrt.
    mean = jnp.mean(x, axis=-1, keepdims=True)
    var = jnp.mean((x - mean) ** 2, axis=-1, keepdims=True)
    return (x - mean) * lax.rsqrt(var + eps) * gamma + beta


def _gelu_exact(x):
    # PyTorch nn.GELU() default is the exact (erf-based) GELU.
    return 0.5 * x * (1.0 + lax.erf(x * (2.0 ** -0.5)))


def block_kernel(heads,
                 x_ref, ln1_g, ln1_b, qkv_w, qkv_b, proj_w, proj_b,
                 ln2_g, ln2_b, fc1_w, fc1_b, fc2_w, fc2_b,
                 out_ref, k_scr, v_scr, attn_scr):
    N, C = x_ref.shape[1], x_ref.shape[2]
    tq = out_ref.shape[1]
    hd = C // heads
    scale = hd ** -0.5
    bf16 = jnp.bfloat16
    f32 = jnp.float32

    q_idx = pl.program_id(1)

    qw = qkv_w[...]            # (C, 3C) bf16
    qb = qkv_b[...]            # (1, 3C) f32
    g1, b1 = ln1_g[...], ln1_b[...]

    # ---- K/V for the full sequence: built once per batch element, cached in VMEM ----
    @pl.when(q_idx == 0)
    def _build_kv():
        xn_all = _layernorm(x_ref[0], g1, b1).astype(bf16)                        # (N, C)
        kv = jnp.dot(xn_all, qw[:, C:], preferred_element_type=f32) + qb[:, C:]   # (N, 2C)
        kpart, vpart = kv[:, :C], kv[:, C:]
        for h in range(heads):                                                    # static, head-major scratch
            k_scr[h] = kpart[:, h * hd:(h + 1) * hd].astype(bf16)
            v_scr[h] = vpart[:, h * hd:(h + 1) * hd].astype(bf16)

    # ---- Attention for this query tile ----
    start = pl.multiple_of(q_idx * tq, tq)
    x_t = x_ref[0, pl.ds(start, tq), :]                                           # (tq, C) f32
    xn = _layernorm(x_t, g1, b1)
    q = jnp.dot(xn.astype(bf16), qw[:, :C], preferred_element_type=f32) + qb[:, :C]
    q = q * scale                                                                 # fold scale into q (tq, C)
    q3 = jnp.stack([q[:, h * hd:(h + 1) * hd] for h in range(heads)],
                   axis=0).astype(bf16)                                           # (heads, tq, hd)

    # batched-head score matmul, k consumed untransposed (contract on last dims)
    s = jnp.einsum('hqd,hkd->hqk', q3, k_scr[...], preferred_element_type=f32)    # (heads, tq, N)
    s = s - jnp.max(s, axis=-1, keepdims=True)
    p = jnp.exp(s)
    p = p * pl.reciprocal(jnp.sum(p, axis=-1, keepdims=True), approx=True)        # softmax (EUP recip)
    o = jnp.einsum('hqk,hkd->hqd', p.astype(bf16), v_scr[...],
                   preferred_element_type=f32)                                    # (heads, tq, hd)

    # recombine heads into a VMEM slab (no lane-axis concatenate), then one proj matmul
    for h in range(heads):
        attn_scr[:, h * hd:(h + 1) * hd] = o[h].astype(bf16)

    y = jnp.dot(attn_scr[...], proj_w[...], preferred_element_type=f32) + proj_b[...]
    x1 = x_t + y                               # residual 1 (drop_path identity at inference)

    # ---- MLP branch ----
    xn2 = _layernorm(x1, ln2_g[...], ln2_b[...])
    h1 = jnp.dot(xn2.astype(bf16), fc1_w[...], preferred_element_type=f32) + fc1_b[...]
    h1 = _gelu_exact(h1)
    h2 = jnp.dot(h1.astype(bf16), fc2_w[...], preferred_element_type=f32) + fc2_b[...]

    out_ref[0] = (x1 + h2).astype(out_ref.dtype)   # residual 2


def _choose_tq(N):
    # query-tile size: a multiple of 8 that divides N (or the full N if it is small/odd)
    if N % 8 != 0:
        return N
    for t in (256, 128, 64, 32, 16, 8):
        if N % t == 0 and t <= N:
            return t
    return N


def block_forward(x, params, heads):
    B, N, C = x.shape
    hd = C // heads
    bf16 = jnp.bfloat16

    # store matmul weights in bf16 (halves weight DMA/VMEM); biases / LN params stay f32
    qkv_w = params["qkv_w"].astype(bf16)
    proj_w = params["proj_w"].astype(bf16)
    fc1_w = params["fc1_w"].astype(bf16)
    fc2_w = params["fc2_w"].astype(bf16)
    mlp_dim = fc1_w.shape[1]

    weight_args = (
        params["ln1_g"], params["ln1_b"],
        qkv_w, params["qkv_b"],
        proj_w, params["proj_b"],
        params["ln2_g"], params["ln2_b"],
        fc1_w, params["fc1_b"],
        fc2_w, params["fc2_b"],
    )

    tq = _choose_tq(N)
    n_q = N // tq

    def full_spec(shape):
        nd = len(shape)
        return pl.BlockSpec(shape, lambda b, q, _nd=nd: (0,) * _nd)

    in_specs = [pl.BlockSpec((1, N, C), lambda b, q: (b, 0, 0))] + \
               [full_spec(w.shape) for w in weight_args]

    # advisory cost estimate for the XLA scheduler
    flops = 2 * B * N * C * 3 * C          # qkv projection
    flops += 4 * B * heads * N * N * hd    # scores + attn @ v
    flops += 2 * B * N * C * C             # output projection
    flops += 4 * B * N * C * mlp_dim       # fc1 + fc2
    transcendentals = B * heads * N * N + B * N * mlp_dim     # softmax exp + GELU erf
    bytes_accessed = 2 * int(x.size) * x.dtype.itemsize + \
        sum(int(w.size) * w.dtype.itemsize for w in weight_args)

    return pl.pallas_call(
        functools.partial(block_kernel, heads),
        out_shape=jax.ShapeDtypeStruct((B, N, C), x.dtype),
        grid_spec=pltpu.PrefetchScalarGridSpec(
            num_scalar_prefetch=0,
            grid=(B, n_q),
            in_specs=in_specs,
            out_specs=pl.BlockSpec((1, tq, C), lambda b, q: (b, q, 0)),
            scratch_shapes=[
                pltpu.VMEM((heads, N, hd), bf16),   # K cache (head-major)
                pltpu.VMEM((heads, N, hd), bf16),   # V cache (head-major)
                pltpu.VMEM((tq, C), bf16),          # recombined attention output slab
            ],
        ),
        compiler_params=pltpu.CompilerParams(
            dimension_semantics=("parallel", "arbitrary"),
            # TODO(synk): for real model sizes set vmem_limit_bytes explicitly
            # (re-derive the tile budget for v7x's 64 MiB VMEM).
        ),
        cost_estimate=pl.CostEstimate(flops=flops,
                                      transcendentals=transcendentals,
                                      bytes_accessed=bytes_accessed),
    )(x, *weight_args)


def reference_forward(x, params, heads):
    """Pure-JAX f32 reference reproducing the PyTorch Block.forward (eval mode)."""
    B, N, C = x.shape
    hd = C // heads
    scale = hd ** -0.5

    def ln(z, g, b):
        m = jnp.mean(z, axis=-1, keepdims=True)
        v = jnp.mean((z - m) ** 2, axis=-1, keepdims=True)
        return (z - m) / jnp.sqrt(v + 1e-5) * g[0] + b[0]

    xn = ln(x, params["ln1_g"], params["ln1_b"])
    qkv = xn @ params["qkv_w"] + params["qkv_b"][0]
    qkv = qkv.reshape(B, N, 3, heads, hd).transpose(2, 0, 3, 1, 4)
    q, k, v = qkv[0], qkv[1], qkv[2]
    attn = jax.nn.softmax((q @ jnp.swapaxes(k, -2, -1)) * scale, axis=-1)
    y = (attn @ v).transpose(0, 2, 1, 3).reshape(B, N, C)
    y = y @ params["proj_w"] + params["proj_b"][0]
    x = x + y
    xn2 = ln(x, params["ln2_g"], params["ln2_b"])
    h = xn2 @ params["fc1_w"] + params["fc1_b"][0]
    h = 0.5 * h * (1.0 + lax.erf(h * (2.0 ** -0.5)))
    h = h @ params["fc2_w"] + params["fc2_b"][0]
    return x + h


if __name__ == "__main__":
    B, N = 2, 8
    dim, heads, mlp_dim = 32, 4, 64

    key = jax.random.PRNGKey(0)
    ks = jax.random.split(key, 10)
    f32 = jnp.float32

    params = {
        "ln1_g": jnp.ones((1, dim), f32),
        "ln1_b": jnp.zeros((1, dim), f32),
        "ln2_g": jnp.ones((1, dim), f32),
        "ln2_b": jnp.zeros((1, dim), f32),
        "qkv_w": 0.05 * jax.random.normal(ks[0], (dim, 3 * dim), f32),
        "qkv_b": 0.05 * jax.random.normal(ks[1], (1, 3 * dim), f32),
        "proj_w": 0.05 * jax.random.normal(ks[2], (dim, dim), f32),
        "proj_b": 0.05 * jax.random.normal(ks[3], (1, dim), f32),
        "fc1_w": 0.05 * jax.random.normal(ks[4], (dim, mlp_dim), f32),
        "fc1_b": 0.05 * jax.random.normal(ks[5], (1, mlp_dim), f32),
        "fc2_w": 0.05 * jax.random.normal(ks[6], (mlp_dim, dim), f32),
        "fc2_b": 0.05 * jax.random.normal(ks[7], (1, dim), f32),
    }

    x = jax.random.normal(ks[8], (B, N, dim), f32)

    out = block_forward(x, params, heads)
    out = jax.block_until_ready(out)

    ref = reference_forward(x, params, heads)
    assert out.shape == (B, N, dim)
    # bf16 matmul inputs + approx reciprocal softmax -> relaxed tolerance vs f32 reference
    assert jnp.allclose(out, ref, atol=2e-2, rtol=2e-2), "mismatch vs reference"

    print("KERNEL_OK")
</pallas_src>

<mosaic_0001>
module attributes {stable_mosaic.version = 11 : i64} {
  func.func @block_kernel(%arg0: i32, %arg1: i32, %arg2: memref<1x8x32xf32, #tpu.memory_space<vmem>>, %arg3: memref<1x32xf32, #tpu.memory_space<vmem>>, %arg4: memref<1x32xf32, #tpu.memory_space<vmem>>, %arg5: memref<32x96xbf16, #tpu.memory_space<vmem>>, %arg6: memref<1x96xf32, #tpu.memory_space<vmem>>, %arg7: memref<32x32xbf16, #tpu.memory_space<vmem>>, %arg8: memref<1x32xf32, #tpu.memory_space<vmem>>, %arg9: memref<1x32xf32, #tpu.memory_space<vmem>>, %arg10: memref<1x32xf32, #tpu.memory_space<vmem>>, %arg11: memref<32x64xbf16, #tpu.memory_space<vmem>>, %arg12: memref<1x64xf32, #tpu.memory_space<vmem>>, %arg13: memref<64x32xbf16, #tpu.memory_space<vmem>>, %arg14: memref<1x32xf32, #tpu.memory_space<vmem>>, %arg15: memref<1x8x32xf32, #tpu.memory_space<vmem>>, %arg16: memref<4x8x8xbf16, #tpu.memory_space<vmem>>, %arg17: memref<4x8x8xbf16, #tpu.memory_space<vmem>>, %arg18: memref<8x32xbf16, #tpu.memory_space<vmem>>) attributes {dimension_semantics = [#tpu.dimension_semantics<parallel>, #tpu.dimension_semantics<arbitrary>], iteration_bounds = array<i64: 2, 1>, scalar_prefetch = 0 : i64, scratch_operands = 3 : i64, tpu.core_type = #tpu.core_type<tc>, window_params = [{transform_indices = @transform_0, window_bounds = array<i64: 1, 8, 32>}, {pipeline_mode = #tpu.pipeline_mode<synchronous>, transform_indices = @transform_1, window_bounds = array<i64: 1, 32>}, {pipeline_mode = #tpu.pipeline_mode<synchronous>, transform_indices = @transform_2, window_bounds = array<i64: 1, 32>}, {pipeline_mode = #tpu.pipeline_mode<synchronous>, transform_indices = @transform_3, window_bounds = array<i64: 32, 96>}, {pipeline_mode = #tpu.pipeline_mode<synchronous>, transform_indices = @transform_4, window_bounds = array<i64: 1, 96>}, {pipeline_mode = #tpu.pipeline_mode<synchronous>, transform_indices = @transform_5, window_bounds = array<i64: 32, 32>}, {pipeline_mode = #tpu.pipeline_mode<synchronous>, transform_indices = @transform_6, window_bounds = array<i64: 1, 32>}, {pipeline_mode = #tpu.pipeline_mode<synchronous>, transform_indices = @transform_7, window_bounds = array<i64: 1, 32>}, {pipeline_mode = #tpu.pipeline_mode<synchronous>, transform_indices = @transform_8, window_bounds = array<i64: 1, 32>}, {pipeline_mode = #tpu.pipeline_mode<synchronous>, transform_indices = @transform_9, window_bounds = array<i64: 32, 64>}, {pipeline_mode = #tpu.pipeline_mode<synchronous>, transform_indices = @transform_10, window_bounds = array<i64: 1, 64>}, {pipeline_mode = #tpu.pipeline_mode<synchronous>, transform_indices = @transform_11, window_bounds = array<i64: 64, 32>}, {pipeline_mode = #tpu.pipeline_mode<synchronous>, transform_indices = @transform_12, window_bounds = array<i64: 1, 32>}, {transform_indices = @transform_13, window_bounds = array<i64: 1, 8, 32>}]} {
    %c0 = arith.constant 0 : index
    %c0_0 = arith.constant 0 : index
    %0 = vector.load %arg5[%c0, %c0_0] : memref<32x96xbf16, #tpu.memory_space<vmem>>, vector<32x96xbf16>
    %c0_1 = arith.constant 0 : index
    %c0_2 = arith.constant 0 : index
    %1 = vector.load %arg6[%c0_1, %c0_2] : memref<1x96xf32, #tpu.memory_space<vmem>>, vector<1x96xf32>
    %c0_3 = arith.constant 0 : index
    %c0_4 = arith.constant 0 : index
    %2 = vector.load %arg3[%c0_3, %c0_4] : memref<1x32xf32, #tpu.memory_space<vmem>>, vector<1x32xf32>
    %c0_5 = arith.constant 0 : index
    %c0_6 = arith.constant 0 : index
    %3 = vector.load %arg4[%c0_5, %c0_6] : memref<1x32xf32, #tpu.memory_space<vmem>>, vector<1x32xf32>
    %c0_i32 = arith.constant 0 : i32
    %4 = arith.cmpi eq, %arg1, %c0_i32 : i32
    %5 = arith.extui %4 : i1 to i32
    %c0_i32_7 = arith.constant 0 : i32
    %6 = arith.cmpi ne, %5, %c0_i32_7 : i32
    scf.if %6 {
      %c0_63 = arith.constant 0 : index
      %c0_64 = arith.constant 0 : index
      %c0_65 = arith.constant 0 : index
      %138 = vector.load %arg2[%c0_63, %c0_64, %c0_65] : memref<1x8x32xf32, #tpu.memory_space<vmem>>, vector<1x8x32xf32>
      %139 = vector.shape_cast %138 : vector<1x8x32xf32> to vector<8x32xf32>
      %cst_66 = arith.constant dense<0.000000e+00> : vector<8xf32>
      %140 = vector.multi_reduction <add>, %139, %cst_66 [1] : vector<8x32xf32> to vector<8xf32>
      %141 = vector.shape_cast %140 : vector<8xf32> to vector<8x1xf32>
      %cst_67 = arith.constant 3.200000e+01 : f32
      %142 = vector.broadcast %cst_67 : f32 to vector<8x1xf32>
      %143 = arith.divf %141, %142 : vector<8x1xf32>
      %144 = vector.broadcast %143 : vector<8x1xf32> to vector<8x32xf32>
      %145 = arith.subf %139, %144 : vector<8x32xf32>
      %146 = arith.mulf %145, %145 : vector<8x32xf32>
      %cst_68 = arith.constant dense<0.000000e+00> : vector<8xf32>
      %147 = vector.multi_reduction <add>, %146, %cst_68 [1] : vector<8x32xf32> to vector<8xf32>
      %148 = vector.shape_cast %147 : vector<8xf32> to vector<8x1xf32>
      %cst_69 = arith.constant 3.200000e+01 : f32
      %149 = vector.broadcast %cst_69 : f32 to vector<8x1xf32>
      %150 = arith.divf %148, %149 : vector<8x1xf32>
      %151 = vector.broadcast %143 : vector<8x1xf32> to vector<8x32xf32>
      %152 = arith.subf %139, %151 : vector<8x32xf32>
      %cst_70 = arith.constant 9.99999974E-6 : f32
      %153 = vector.broadcast %cst_70 : f32 to vector<8x1xf32>
      %154 = arith.addf %150, %153 : vector<8x1xf32>
      %155 = math.rsqrt %154 : vector<8x1xf32>
      %156 = vector.broadcast %155 : vector<8x1xf32> to vector<8x32xf32>
      %157 = arith.mulf %152, %156 : vector<8x32xf32>
      %158 = vector.broadcast %2 : vector<1x32xf32> to vector<8x32xf32>
      %159 = arith.mulf %157, %158 : vector<8x32xf32>
      %160 = vector.broadcast %3 : vector<1x32xf32> to vector<8x32xf32>
      %161 = arith.addf %159, %160 : vector<8x32xf32>
      %162 = arith.truncf %161 : vector<8x32xf32> to vector<8x32xbf16>
      %163 = vector.extract_strided_slice %0 {offsets = [0, 32], sizes = [32, 64], strides = [1, 1]} : vector<32x96xbf16> to vector<32x64xbf16>
      %cst_71 = arith.constant dense<0.000000e+00> : vector<8x64xf32>
      %164 = tpu.matmul %162, %163, %cst_71 {dimension_numbers = #tpu.dot_dimension_numbers<[1], [0], [0], [1], [0, 0, 1, 1], [], []>} : vector<8x32xbf16>, vector<32x64xbf16>, vector<8x64xf32> -> vector<8x64xf32>
      %165 = vector.extract_strided_slice %1 {offsets = [0, 32], sizes = [1, 64], strides = [1, 1]} : vector<1x96xf32> to vector<1x64xf32>
      %166 = vector.broadcast %165 : vector<1x64xf32> to vector<8x64xf32>
      %167 = arith.addf %164, %166 : vector<8x64xf32>
      %168 = vector.extract_strided_slice %167 {offsets = [0, 0], sizes = [8, 32], strides = [1, 1]} : vector<8x64xf32> to vector<8x32xf32>
      %169 = vector.extract_strided_slice %167 {offsets = [0, 32], sizes = [8, 32], strides = [1, 1]} : vector<8x64xf32> to vector<8x32xf32>
      %170 = vector.extract_strided_slice %168 {offsets = [0, 0], sizes = [8, 8], strides = [1, 1]} : vector<8x32xf32> to vector<8x8xf32>
      %171 = arith.truncf %170 : vector<8x8xf32> to vector<8x8xbf16>
      %c0_72 = arith.constant 0 : index
      %c0_73 = arith.constant 0 : index
      %c0_74 = arith.constant 0 : index
      %172 = vector.load %arg16[%c0_72, %c0_73, %c0_74] : memref<4x8x8xbf16, #tpu.memory_space<vmem>>, vector<1x8x8xbf16>
      %173 = vector.shape_cast %172 : vector<1x8x8xbf16> to vector<8x8xbf16>
      %174 = vector.shape_cast %171 : vector<8x8xbf16> to vector<1x8x8xbf16>
      tpu.vector_store %arg16[%c0_72, %c0_73, %c0_74], %174 {strides = array<i32>} : memref<4x8x8xbf16, #tpu.memory_space<vmem>>, vector<1x8x8xbf16>,
      %175 = vector.extract_strided_slice %169 {offsets = [0, 0], sizes = [8, 8], strides = [1, 1]} : vector<8x32xf32> to vector<8x8xf32>
      %176 = arith.truncf %175 : vector<8x8xf32> to vector<8x8xbf16>
      %c0_75 = arith.constant 0 : index
      %c0_76 = arith.constant 0 : index
      %c0_77 = arith.constant 0 : index
      %177 = vector.load %arg17[%c0_75, %c0_76, %c0_77] : memref<4x8x8xbf16, #tpu.memory_space<vmem>>, vector<1x8x8xbf16>
      %178 = vector.shape_cast %177 : vector<1x8x8xbf16> to vector<8x8xbf16>
      %179 = vector.shape_cast %176 : vector<8x8xbf16> to vector<1x8x8xbf16>
      tpu.vector_store %arg17[%c0_75, %c0_76, %c0_77], %179 {strides = array<i32>} : memref<4x8x8xbf16, #tpu.memory_space<vmem>>, vector<1x8x8xbf16>,
      %180 = vector.extract_strided_slice %168 {offsets = [0, 8], sizes = [8, 8], strides = [1, 1]} : vector<8x32xf32> to vector<8x8xf32>
      %181 = arith.truncf %180 : vector<8x8xf32> to vector<8x8xbf16>
      %c1 = arith.constant 1 : index
      %c0_78 = arith.constant 0 : index
      %c0_79 = arith.constant 0 : index
      %182 = vector.load %arg16[%c1, %c0_78, %c0_79] : memref<4x8x8xbf16, #tpu.memory_space<vmem>>, vector<1x8x8xbf16>
      %183 = vector.shape_cast %182 : vector<1x8x8xbf16> to vector<8x8xbf16>
      %184 = vector.shape_cast %181 : vector<8x8xbf16> to vector<1x8x8xbf16>
      tpu.vector_store %arg16[%c1, %c0_78, %c0_79], %184 {strides = array<i32>} : memref<4x8x8xbf16, #tpu.memory_space<vmem>>, vector<1x8x8xbf16>,
      %185 = vector.extract_strided_slice %169 {offsets = [0, 8], sizes = [8, 8], strides = [1, 1]} : vector<8x32xf32> to vector<8x8xf32>
      %186 = arith.truncf %185 : vector<8x8xf32> to vector<8x8xbf16>
      %c1_80 = arith.constant 1 : index
      %c0_81 = arith.constant 0 : index
      %c0_82 = arith.constant 0 : index
      %187 = vector.load %arg17[%c1_80, %c0_81, %c0_82] : memref<4x8x8xbf16, #tpu.memory_space<vmem>>, vector<1x8x8xbf16>
      %188 = vector.shape_cast %187 : vector<1x8x8xbf16> to vector<8x8xbf16>
      %189 = vector.shape_cast %186 : vector<8x8xbf16> to vector<1x8x8xbf16>
      tpu.vector_store %arg17[%c1_80, %c0_81, %c0_82], %189 {strides = array<i32>} : memref<4x8x8xbf16, #tpu.memory_space<vmem>>, vector<1x8x8xbf16>,
      %190 = vector.extract_strided_slice %168 {offsets = [0, 16], sizes = [8, 8], strides = [1, 1]} : vector<8x32xf32> to vector<8x8xf32>
      %191 = arith.truncf %190 : vector<8x8xf32> to vector<8x8xbf16>
      %c2 = arith.constant 2 : index
      %c0_83 = arith.constant 0 : index
      %c0_84 = arith.constant 0 : index
      %192 = vector.load %arg16[%c2, %c0_83, %c0_84] : memref<4x8x8xbf16, #tpu.memory_space<vmem>>, vector<1x8x8xbf16>
      %193 = vector.shape_cast %192 : vector<1x8x8xbf16> to vector<8x8xbf16>
      %194 = vector.shape_cast %191 : vector<8x8xbf16> to vector<1x8x8xbf16>
      tpu.vector_store %arg16[%c2, %c0_83, %c0_84], %194 {strides = array<i32>} : memref<4x8x8xbf16, #tpu.memory_space<vmem>>, vector<1x8x8xbf16>,
      %195 = vector.extract_strided_slice %169 {offsets = [0, 16], sizes = [8, 8], strides = [1, 1]} : vector<8x32xf32> to vector<8x8xf32>
      %196 = arith.truncf %195 : vector<8x8xf32> to vector<8x8xbf16>
      %c2_85 = arith.constant 2 : index
      %c0_86 = arith.constant 0 : index
      %c0_87 = arith.constant 0 : index
      %197 = vector.load %arg17[%c2_85, %c0_86, %c0_87] : memref<4x8x8xbf16, #tpu.memory_space<vmem>>, vector<1x8x8xbf16>
      %198 = vector.shape_cast %197 : vector<1x8x8xbf16> to vector<8x8xbf16>
      %199 = vector.shape_cast %196 : vector<8x8xbf16> to vector<1x8x8xbf16>
      tpu.vector_store %arg17[%c2_85, %c0_86, %c0_87], %199 {strides = array<i32>} : memref<4x8x8xbf16, #tpu.memory_space<vmem>>, vector<1x8x8xbf16>,
      %200 = vector.extract_strided_slice %168 {offsets = [0, 24], sizes = [8, 8], strides = [1, 1]} : vector<8x32xf32> to vector<8x8xf32>
      %201 = arith.truncf %200 : vector<8x8xf32> to vector<8x8xbf16>
      %c3 = arith.constant 3 : index
      %c0_88 = arith.constant 0 : index
      %c0_89 = arith.constant 0 : index
      %202 = vector.load %arg16[%c3, %c0_88, %c0_89] : memref<4x8x8xbf16, #tpu.memory_space<vmem>>, vector<1x8x8xbf16>
      %203 = vector.shape_cast %202 : vector<1x8x8xbf16> to vector<8x8xbf16>
      %204 = vector.shape_cast %201 : vector<8x8xbf16> to vector<1x8x8xbf16>
      tpu.vector_store %arg16[%c3, %c0_88, %c0_89], %204 {strides = array<i32>} : memref<4x8x8xbf16, #tpu.memory_space<vmem>>, vector<1x8x8xbf16>,
      %205 = vector.extract_strided_slice %169 {offsets = [0, 24], sizes = [8, 8], strides = [1, 1]} : vector<8x32xf32> to vector<8x8xf32>
      %206 = arith.truncf %205 : vector<8x8xf32> to vector<8x8xbf16>
      %c3_90 = arith.constant 3 : index
      %c0_91 = arith.constant 0 : index
      %c0_92 = arith.constant 0 : index
      %207 = vector.load %arg17[%c3_90, %c0_91, %c0_92] : memref<4x8x8xbf16, #tpu.memory_space<vmem>>, vector<1x8x8xbf16>
      %208 = vector.shape_cast %207 : vector<1x8x8xbf16> to vector<8x8xbf16>
      %209 = vector.shape_cast %206 : vector<8x8xbf16> to vector<1x8x8xbf16>
      tpu.vector_store %arg17[%c3_90, %c0_91, %c0_92], %209 {strides = array<i32>} : memref<4x8x8xbf16, #tpu.memory_space<vmem>>, vector<1x8x8xbf16>,
    } else {
    }
    %c8_i32 = arith.constant 8 : i32
    %7 = arith.muli %arg1, %c8_i32 : i32
    %8 = tpu.assume_multiple %7, 8 : i32
    %c0_8 = arith.constant 0 : index
    %9 = arith.index_cast %8 : i32 to index
    %c0_9 = arith.constant 0 : index
    %10 = vector.load %arg2[%c0_8, %9, %c0_9] : memref<1x8x32xf32, #tpu.memory_space<vmem>>, vector<1x8x32xf32>
    %11 = vector.shape_cast %10 : vector<1x8x32xf32> to vector<8x32xf32>
    %cst = arith.constant dense<0.000000e+00> : vector<8xf32>
    %12 = vector.multi_reduction <add>, %11, %cst [1] : vector<8x32xf32> to vector<8xf32>
    %13 = vector.shape_cast %12 : vector<8xf32> to vector<8x1xf32>
    %cst_10 = arith.constant 3.200000e+01 : f32
    %14 = vector.broadcast %cst_10 : f32 to vector<8x1xf32>
    %15 = arith.divf %13, %14 : vector<8x1xf32>
    %16 = vector.broadcast %15 : vector<8x1xf32> to vector<8x32xf32>
    %17 = arith.subf %11, %16 : vector<8x32xf32>
    %18 = arith.mulf %17, %17 : vector<8x32xf32>
    %cst_11 = arith.constant dense<0.000000e+00> : vector<8xf32>
    %19 = vector.multi_reduction <add>, %18, %cst_11 [1] : vector<8x32xf32> to vector<8xf32>
    %20 = vector.shape_cast %19 : vector<8xf32> to vector<8x1xf32>
    %cst_12 = arith.constant 3.200000e+01 : f32
    %21 = vector.broadcast %cst_12 : f32 to vector<8x1xf32>
    %22 = arith.divf %20, %21 : vector<8x1xf32>
    %23 = vector.broadcast %15 : vector<8x1xf32> to vector<8x32xf32>
    %24 = arith.subf %11, %23 : vector<8x32xf32>
    %cst_13 = arith.constant 9.99999974E-6 : f32
    %25 = vector.broadcast %cst_13 : f32 to vector<8x1xf32>
    %26 = arith.addf %22, %25 : vector<8x1xf32>
    %27 = math.rsqrt %26 : vector<8x1xf32>
    %28 = vector.broadcast %27 : vector<8x1xf32> to vector<8x32xf32>
    %29 = arith.mulf %24, %28 : vector<8x32xf32>
    %30 = vector.broadcast %2 : vector<1x32xf32> to vector<8x32xf32>
    %31 = arith.mulf %29, %30 : vector<8x32xf32>
    %32 = vector.broadcast %3 : vector<1x32xf32> to vector<8x32xf32>
    %33 = arith.addf %31, %32 : vector<8x32xf32>
    %34 = arith.truncf %33 : vector<8x32xf32> to vector<8x32xbf16>
    %35 = vector.extract_strided_slice %0 {offsets = [0, 0], sizes = [32, 32], strides = [1, 1]} : vector<32x96xbf16> to vector<32x32xbf16>
    %cst_14 = arith.constant dense<0.000000e+00> : vector<8x32xf32>
    %36 = tpu.matmul %34, %35, %cst_14 {dimension_numbers = #tpu.dot_dimension_numbers<[1], [0], [0], [1], [0, 0, 1, 1], [], []>} : vector<8x32xbf16>, vector<32x32xbf16>, vector<8x32xf32> -> vector<8x32xf32>
    %37 = vector.extract_strided_slice %1 {offsets = [0, 0], sizes = [1, 32], strides = [1, 1]} : vector<1x96xf32> to vector<1x32xf32>
    %38 = vector.broadcast %37 : vector<1x32xf32> to vector<8x32xf32>
    %39 = arith.addf %36, %38 : vector<8x32xf32>
    %cst_15 = arith.constant 0.353553385 : f32
    %40 = vector.broadcast %cst_15 : f32 to vector<8x32xf32>
    %41 = arith.mulf %39, %40 : vector<8x32xf32>
    %42 = vector.extract_strided_slice %41 {offsets = [0, 0], sizes = [8, 8], strides = [1, 1]} : vector<8x32xf32> to vector<8x8xf32>
    %43 = vector.extract_strided_slice %41 {offsets = [0, 8], sizes = [8, 8], strides = [1, 1]} : vector<8x32xf32> to vector<8x8xf32>
    %44 = vector.extract_strided_slice %41 {offsets = [0, 16], sizes = [8, 8], strides = [1, 1]} : vector<8x32xf32> to vector<8x8xf32>
    %45 = vector.extract_strided_slice %41 {offsets = [0, 24], sizes = [8, 8], strides = [1, 1]} : vector<8x32xf32> to vector<8x8xf32>
    %46 = vector.shape_cast %42 : vector<8x8xf32> to vector<1x8x8xf32>
    %47 = vector.shape_cast %43 : vector<8x8xf32> to vector<1x8x8xf32>
    %48 = vector.shape_cast %44 : vector<8x8xf32> to vector<1x8x8xf32>
    %49 = vector.shape_cast %45 : vector<8x8xf32> to vector<1x8x8xf32>
    %50 = tpu.concatenate %46, %47, %48, %49 in 0 : vector<1x8x8xf32>, vector<1x8x8xf32>, vector<1x8x8xf32>, vector<1x8x8xf32> -> vector<4x8x8xf32>
    %51 = arith.truncf %50 : vector<4x8x8xf32> to vector<4x8x8xbf16>
    %c0_16 = arith.constant 0 : index
    %c0_17 = arith.constant 0 : index
    %c0_18 = arith.constant 0 : index
    %52 = vector.load %arg16[%c0_16, %c0_17, %c0_18] : memref<4x8x8xbf16, #tpu.memory_space<vmem>>, vector<4x8x8xbf16>
    "tpu.trace_start"() <{level = 10 : i32, message = "hqd,hkd->hqk"}> : () -> ()
    %cst_19 = arith.constant dense<0.000000e+00> : vector<4x8x8xf32>
    %53 = tpu.matmul %51, %52, %cst_19 {dimension_numbers = #tpu.dot_dimension_numbers<[2], [2], [1], [1], [0, 0, 0, 1, 1, 1], [0], [0]>} : vector<4x8x8xbf16>, vector<4x8x8xbf16>, vector<4x8x8xf32> -> vector<4x8x8xf32>
    "tpu.trace_stop"() : () -> ()
    %cst_20 = arith.constant dense<0xFF800000> : vector<4x8xf32>
    %54 = vector.multi_reduction <maximumf>, %53, %cst_20 [2] : vector<4x8x8xf32> to vector<4x8xf32>
    %55 = vector.shape_cast %54 : vector<4x8xf32> to vector<4x8x1xf32>
    %56 = vector.broadcast %55 : vector<4x8x1xf32> to vector<4x8x8xf32>
    %57 = arith.subf %53, %56 : vector<4x8x8xf32>
    %58 = math.exp %57 : vector<4x8x8xf32>
    %cst_21 = arith.constant dense<0.000000e+00> : vector<4x8xf32>
    %59 = vector.multi_reduction <add>, %58, %cst_21 [2] : vector<4x8x8xf32> to vector<4x8xf32>
    %60 = vector.shape_cast %59 : vector<4x8xf32> to vector<4x8x1xf32>
    %61 = tpu.reciprocal %60 {approx = true} : vector<4x8x1xf32> -> vector<4x8x1xf32>
    %62 = vector.broadcast %61 : vector<4x8x1xf32> to vector<4x8x8xf32>
    %63 = arith.mulf %58, %62 : vector<4x8x8xf32>
    %64 = arith.truncf %63 : vector<4x8x8xf32> to vector<4x8x8xbf16>
    %c0_22 = arith.constant 0 : index
    %c0_23 = arith.constant 0 : index
    %c0_24 = arith.constant 0 : index
    %65 = vector.load %arg17[%c0_22, %c0_23, %c0_24] : memref<4x8x8xbf16, #tpu.memory_space<vmem>>, vector<4x8x8xbf16>
    "tpu.trace_start"() <{level = 10 : i32, message = "hqk,hkd->hqd"}> : () -> ()
    %cst_25 = arith.constant dense<0.000000e+00> : vector<4x8x8xf32>
    %66 = tpu.matmul %64, %65, %cst_25 {dimension_numbers = #tpu.dot_dimension_numbers<[2], [1], [1], [2], [0, 0, 0, 1, 1, 2], [0], [0]>} : vector<4x8x8xbf16>, vector<4x8x8xbf16>, vector<4x8x8xf32> -> vector<4x8x8xf32>
    "tpu.trace_stop"() : () -> ()
    %67 = vector.extract_strided_slice %66 {offsets = [0, 0, 0], sizes = [1, 8, 8], strides = [1, 1, 1]} : vector<4x8x8xf32> to vector<1x8x8xf32>
    %68 = vector.shape_cast %67 : vector<1x8x8xf32> to vector<8x8xf32>
    %69 = arith.truncf %68 : vector<8x8xf32> to vector<8x8xbf16>
    %c0_26 = arith.constant 0 : index
    %c0_27 = arith.constant 0 : index
    %70 = vector.load %arg18[%c0_26, %c0_27] : memref<8x32xbf16, #tpu.memory_space<vmem>>, vector<8x8xbf16>
    tpu.vector_store %arg18[%c0_26, %c0_27], %69 {strides = array<i32>} : memref<8x32xbf16, #tpu.memory_space<vmem>>, vector<8x8xbf16>,
    %71 = vector.extract_strided_slice %66 {offsets = [1, 0, 0], sizes = [1, 8, 8], strides = [1, 1, 1]} : vector<4x8x8xf32> to vector<1x8x8xf32>
    %72 = vector.shape_cast %71 : vector<1x8x8xf32> to vector<8x8xf32>
    %73 = arith.truncf %72 : vector<8x8xf32> to vector<8x8xbf16>
    %c0_28 = arith.constant 0 : index
    %c8 = arith.constant 8 : index
    %74 = vector.load %arg18[%c0_28, %c8] : memref<8x32xbf16, #tpu.memory_space<vmem>>, vector<8x8xbf16>
    tpu.vector_store %arg18[%c0_28, %c8], %73 {strides = array<i32>} : memref<8x32xbf16, #tpu.memory_space<vmem>>, vector<8x8xbf16>,
    %75 = vector.extract_strided_slice %66 {offsets = [2, 0, 0], sizes = [1, 8, 8], strides = [1, 1, 1]} : vector<4x8x8xf32> to vector<1x8x8xf32>
    %76 = vector.shape_cast %75 : vector<1x8x8xf32> to vector<8x8xf32>
    %77 = arith.truncf %76 : vector<8x8xf32> to vector<8x8xbf16>
    %c0_29 = arith.constant 0 : index
    %c16 = arith.constant 16 : index
    %78 = vector.load %arg18[%c0_29, %c16] : memref<8x32xbf16, #tpu.memory_space<vmem>>, vector<8x8xbf16>
    tpu.vector_store %arg18[%c0_29, %c16], %77 {strides = array<i32>} : memref<8x32xbf16, #tpu.memory_space<vmem>>, vector<8x8xbf16>,
    %79 = vector.extract_strided_slice %66 {offsets = [3, 0, 0], sizes = [1, 8, 8], strides = [1, 1, 1]} : vector<4x8x8xf32> to vector<1x8x8xf32>
    %80 = vector.shape_cast %79 : vector<1x8x8xf32> to vector<8x8xf32>
    %81 = arith.truncf %80 : vector<8x8xf32> to vector<8x8xbf16>
    %c0_30 = arith.constant 0 : index
    %c24 = arith.constant 24 : index
    %82 = vector.load %arg18[%c0_30, %c24] : memref<8x32xbf16, #tpu.memory_space<vmem>>, vector<8x8xbf16>
    tpu.vector_store %arg18[%c0_30, %c24], %81 {strides = array<i32>} : memref<8x32xbf16, #tpu.memory_space<vmem>>, vector<8x8xbf16>,
    %c0_31 = arith.constant 0 : index
    %c0_32 = arith.constant 0 : index
    %83 = vector.load %arg18[%c0_31, %c0_32] : memref<8x32xbf16, #tpu.memory_space<vmem>>, vector<8x32xbf16>
    %c0_33 = arith.constant 0 : index
    %c0_34 = arith.constant 0 : index
    %84 = vector.load %arg7[%c0_33, %c0_34] : memref<32x32xbf16, #tpu.memory_space<vmem>>, vector<32x32xbf16>
    %cst_35 = arith.constant dense<0.000000e+00> : vector<8x32xf32>
    %85 = tpu.matmul %83, %84, %cst_35 {dimension_numbers = #tpu.dot_dimension_numbers<[1], [0], [0], [1], [0, 0, 1, 1], [], []>} : vector<8x32xbf16>, vector<32x32xbf16>, vector<8x32xf32> -> vector<8x32xf32>
    %c0_36 = arith.constant 0 : index
    %c0_37 = arith.constant 0 : index
    %86 = vector.load %arg8[%c0_36, %c0_37] : memref<1x32xf32, #tpu.memory_space<vmem>>, vector<1x32xf32>
    %87 = vector.broadcast %86 : vector<1x32xf32> to vector<8x32xf32>
    %88 = arith.addf %85, %87 : vector<8x32xf32>
    %89 = arith.addf %11, %88 : vector<8x32xf32>
    %c0_38 = arith.constant 0 : index
    %c0_39 = arith.constant 0 : index
    %90 = vector.load %arg9[%c0_38, %c0_39] : memref<1x32xf32, #tpu.memory_space<vmem>>, vector<1x32xf32>
    %c0_40 = arith.constant 0 : index
    %c0_41 = arith.constant 0 : index
    %91 = vector.load %arg10[%c0_40, %c0_41] : memref<1x32xf32, #tpu.memory_space<vmem>>, vector<1x32xf32>
    %cst_42 = arith.constant dense<0.000000e+00> : vector<8xf32>
    %92 = vector.multi_reduction <add>, %89, %cst_42 [1] : vector<8x32xf32> to vector<8xf32>
    %93 = vector.shape_cast %92 : vector<8xf32> to vector<8x1xf32>
    %cst_43 = arith.constant 3.200000e+01 : f32
    %94 = vector.broadcast %cst_43 : f32 to vector<8x1xf32>
    %95 = arith.divf %93, %94 : vector<8x1xf32>
    %96 = vector.broadcast %95 : vector<8x1xf32> to vector<8x32xf32>
    %97 = arith.subf %89, %96 : vector<8x32xf32>
    %98 = arith.mulf %97, %97 : vector<8x32xf32>
    %cst_44 = arith.constant dense<0.000000e+00> : vector<8xf32>
    %99 = vector.multi_reduction <add>, %98, %cst_44 [1] : vector<8x32xf32> to vector<8xf32>
    %100 = vector.shape_cast %99 : vector<8xf32> to vector<8x1xf32>
    %cst_45 = arith.constant 3.200000e+01 : f32
    %101 = vector.broadcast %cst_45 : f32 to vector<8x1xf32>
    %102 = arith.divf %100, %101 : vector<8x1xf32>
    %103 = vector.broadcast %95 : vector<8x1xf32> to vector<8x32xf32>
    %104 = arith.subf %89, %103 : vector<8x32xf32>
    %cst_46 = arith.constant 9.99999974E-6 : f32
    %105 = vector.broadcast %cst_46 : f32 to vector<8x1xf32>
    %106 = arith.addf %102, %105 : vector<8x1xf32>
    %107 = math.rsqrt %106 : vector<8x1xf32>
    %108 = vector.broadcast %107 : vector<8x1xf32> to vector<8x32xf32>
    %109 = arith.mulf %104, %108 : vector<8x32xf32>
    %110 = vector.broadcast %90 : vector<1x32xf32> to vector<8x32xf32>
    %111 = arith.mulf %109, %110 : vector<8x32xf32>
    %112 = vector.broadcast %91 : vector<1x32xf32> to vector<8x32xf32>
    %113 = arith.addf %111, %112 : vector<8x32xf32>
    %114 = arith.truncf %113 : vector<8x32xf32> to vector<8x32xbf16>
    %c0_47 = arith.constant 0 : index
    %c0_48 = arith.constant 0 : index
    %115 = vector.load %arg11[%c0_47, %c0_48] : memref<32x64xbf16, #tpu.memory_space<vmem>>, vector<32x64xbf16>
    %cst_49 = arith.constant dense<0.000000e+00> : vector<8x64xf32>
    %116 = tpu.matmul %114, %115, %cst_49 {dimension_numbers = #tpu.dot_dimension_numbers<[1], [0], [0], [1], [0, 0, 1, 1], [], []>} : vector<8x32xbf16>, vector<32x64xbf16>, vector<8x64xf32> -> vector<8x64xf32>
    %c0_50 = arith.constant 0 : index
    %c0_51 = arith.constant 0 : index
    %117 = vector.load %arg12[%c0_50, %c0_51] : memref<1x64xf32, #tpu.memory_space<vmem>>, vector<1x64xf32>
    %118 = vector.broadcast %117 : vector<1x64xf32> to vector<8x64xf32>
    %119 = arith.addf %116, %118 : vector<8x64xf32>
    %cst_52 = arith.constant 5.000000e-01 : f32
    %120 = vector.broadcast %cst_52 : f32 to vector<8x64xf32>
    %121 = arith.mulf %120, %119 : vector<8x64xf32>
    %cst_53 = arith.constant 0.707106769 : f32
    %122 = vector.broadcast %cst_53 : f32 to vector<8x64xf32>
    %123 = arith.mulf %119, %122 : vector<8x64xf32>
    %124 = math.erf %123 : vector<8x64xf32>
    %cst_54 = arith.constant 1.000000e+00 : f32
    %125 = vector.broadcast %cst_54 : f32 to vector<8x64xf32>
    %126 = arith.addf %125, %124 : vector<8x64xf32>
    %127 = arith.mulf %121, %126 : vector<8x64xf32>
    %128 = arith.truncf %127 : vector<8x64xf32> to vector<8x64xbf16>
    %c0_55 = arith.constant 0 : index
    %c0_56 = arith.constant 0 : index
    %129 = vector.load %arg13[%c0_55, %c0_56] : memref<64x32xbf16, #tpu.memory_space<vmem>>, vector<64x32xbf16>
    %cst_57 = arith.constant dense<0.000000e+00> : vector<8x32xf32>
    %130 = tpu.matmul %128, %129, %cst_57 {dimension_numbers = #tpu.dot_dimension_numbers<[1], [0], [0], [1], [0, 0, 1, 1], [], []>} : vector<8x64xbf16>, vector<64x32xbf16>, vector<8x32xf32> -> vector<8x32xf32>
    %c0_58 = arith.constant 0 : index
    %c0_59 = arith.constant 0 : index
    %131 = vector.load %arg14[%c0_58, %c0_59] : memref<1x32xf32, #tpu.memory_space<vmem>>, vector<1x32xf32>
    %132 = vector.broadcast %131 : vector<1x32xf32> to vector<8x32xf32>
    %133 = arith.addf %130, %132 : vector<8x32xf32>
    %134 = arith.addf %89, %133 : vector<8x32xf32>
    %c0_60 = arith.constant 0 : index
    %c0_61 = arith.constant 0 : index
    %c0_62 = arith.constant 0 : index
    %135 = vector.load %arg15[%c0_60, %c0_61, %c0_62] : memref<1x8x32xf32, #tpu.memory_space<vmem>>, vector<1x8x32xf32>
    %136 = vector.shape_cast %135 : vector<1x8x32xf32> to vector<8x32xf32>
    %137 = vector.shape_cast %134 : vector<8x32xf32> to vector<1x8x32xf32>
    tpu.vector_store %arg15[%c0_60, %c0_61, %c0_62], %137 {strides = array<i32>} : memref<1x8x32xf32, #tpu.memory_space<vmem>>, vector<1x8x32xf32>,
    return
  }
  func.func @transform_0(%arg0: i32, %arg1: i32) -> (i32, i32, i32) {
    %c0_i32 = arith.constant 0 : i32
    %c0_i32_0 = arith.constant 0 : i32
    %c0_i32_1 = arith.constant 0 : i32
    return %arg0, %c0_i32, %c0_i32_0 : i32, i32, i32
  }
  func.func @transform_1(%arg0: i32, %arg1: i32) -> (i32, i32) {
    %c0_i32 = arith.constant 0 : i32
    %c0_i32_0 = arith.constant 0 : i32
    %c0_i32_1 = arith.constant 0 : i32
    return %c0_i32, %c0_i32_0 : i32, i32
  }
  func.func @transform_2(%arg0: i32, %arg1: i32) -> (i32, i32) {
    %c0_i32 = arith.constant 0 : i32
    %c0_i32_0 = arith.constant 0 : i32
    %c0_i32_1 = arith.constant 0 : i32
    return %c0_i32, %c0_i32_0 : i32, i32
  }
  func.func @transform_3(%arg0: i32, %arg1: i32) -> (i32, i32) {
    %c0_i32 = arith.constant 0 : i32
    %c0_i32_0 = arith.constant 0 : i32
    %c0_i32_1 = arith.constant 0 : i32
    return %c0_i32, %c0_i32_0 : i32, i32
  }
  func.func @transform_4(%arg0: i32, %arg1: i32) -> (i32, i32) {
    %c0_i32 = arith.constant 0 : i32
    %c0_i32_0 = arith.constant 0 : i32
    %c0_i32_1 = arith.constant 0 : i32
    return %c0_i32, %c0_i32_0 : i32, i32
  }
  func.func @transform_5(%arg0: i32, %arg1: i32) -> (i32, i32) {
    %c0_i32 = arith.constant 0 : i32
    %c0_i32_0 = arith.constant 0 : i32
    %c0_i32_1 = arith.constant 0 : i32
    return %c0_i32, %c0_i32_0 : i32, i32
  }
  func.func @transform_6(%arg0: i32, %arg1: i32) -> (i32, i32) {
    %c0_i32 = arith.constant 0 : i32
    %c0_i32_0 = arith.constant 0 : i32
    %c0_i32_1 = arith.constant 0 : i32
    return %c0_i32, %c0_i32_0 : i32, i32
  }
  func.func @transform_7(%arg0: i32, %arg1: i32) -> (i32, i32) {
    %c0_i32 = arith.constant 0 : i32
    %c0_i32_0 = arith.constant 0 : i32
    %c0_i32_1 = arith.constant 0 : i32
    return %c0_i32, %c0_i32_0 : i32, i32
  }
  func.func @transform_8(%arg0: i32, %arg1: i32) -> (i32, i32) {
    %c0_i32 = arith.constant 0 : i32
    %c0_i32_0 = arith.constant 0 : i32
    %c0_i32_1 = arith.constant 0 : i32
    return %c0_i32, %c0_i32_0 : i32, i32
  }
  func.func @transform_9(%arg0: i32, %arg1: i32) -> (i32, i32) {
    %c0_i32 = arith.constant 0 : i32
    %c0_i32_0 = arith.constant 0 : i32
    %c0_i32_1 = arith.constant 0 : i32
    return %c0_i32, %c0_i32_0 : i32, i32
  }
  func.func @transform_10(%arg0: i32, %arg1: i32) -> (i32, i32) {
    %c0_i32 = arith.constant 0 : i32
    %c0_i32_0 = arith.constant 0 : i32
    %c0_i32_1 = arith.constant 0 : i32
    return %c0_i32, %c0_i32_0 : i32, i32
  }
  func.func @transform_11(%arg0: i32, %arg1: i32) -> (i32, i32) {
    %c0_i32 = arith.constant 0 : i32
    %c0_i32_0 = arith.constant 0 : i32
    %c0_i32_1 = arith.constant 0 : i32
    return %c0_i32, %c0_i32_0 : i32, i32
  }
  func.func @transform_12(%arg0: i32, %arg1: i32) -> (i32, i32) {
    %c0_i32 = arith.constant 0 : i32
    %c0_i32_0 = arith.constant 0 : i32
    %c0_i32_1 = arith.constant 0 : i32
    return %c0_i32, %c0_i32_0 : i32, i32
  }
  func.func @transform_13(%arg0: i32, %arg1: i32) -> (i32, i32, i32) {
    %c0_i32 = arith.constant 0 : i32
    %c0_i32_0 = arith.constant 0 : i32
    return %arg0, %arg1, %c0_i32 : i32, i32, i32
  }
}

</mosaic_0001>

<bundles_post_ra>
// kernel: tpu_custom_call.1
= control target key start
LH: loop header
LB: loop body
LE: loop exit
PB: predicated region body
PF: predicated region fallthrough
CT: control target
= control target key end

     0   :  { %18 = vsyncpa [#allocation6], 0  ;;  %s1944_s0 = inlined_call_operand.vmem [shape: f32[2,8,32], index: 0, kind: input, shape index: {}]   ;;  %s1945_s1 = inlined_call_operand.hbm [shape: f32[1,32], index: 1, kind: input, shape index: {}]   ;;  %s1946_s2 = inlined_call_operand.vmem [shape: f32[1,32], index: 2, kind: input, shape index: {}]   ;;  %s1947_s3 = inlined_call_operand.vmem [shape: bf16[32,96], index: 3, kind: input, shape index: {}]   ;;  %s1948_s4 = inlined_call_operand.vmem [shape: f32[1,96], index: 4, kind: input, shape index: {}]   ;;  %s1949_s5 = inlined_call_operand.vmem [shape: bf16[32,32], index: 5, kind: input, shape index: {}]   ;;  %s1950_s6 = inlined_call_operand.vmem [shape: f32[1,32], index: 6, kind: input, shape index: {}]   ;;  %s1951_s7 = inlined_call_operand.vmem [shape: f32[1,32], index: 7, kind: input, shape index: {}]   ;;  %s1952_s8 = inlined_call_operand.vmem [shape: f32[1,32], index: 8, kind: input, shape index: {}]   ;;  %s1953_s9 = inlined_call_operand.hbm [shape: bf16[32,64], index: 9, kind: input, shape index: {}]   ;;  %s1954_s10 = inlined_call_operand.vmem [shape: f32[1,64], index: 10, kind: input, shape index: {}]   ;;  %s1955_s11 = inlined_call_operand.vmem [shape: bf16[64,32], index: 11, kind: input, shape index: {}]   ;;  %s1956_s12 = inlined_call_operand.vmem [shape: f32[1,32], index: 12, kind: input, shape index: {}]   ;;  %s1957_s13 = inlined_call_operand.hbm [shape: f32[2,8,32], index: 13, kind: output, shape index: {}]  }
   0x1   :  { %19 = vsyncpa [#allocation9], 0 }
   0x2   :  { %20 = vsyncpa [#allocation7], 0 }
   0x3   :  { %22 = vsyncpa [#allocation7 + $0x1], 0  ;;  %s1692_s25 = smov 0   ;;  %s1694_s26 = smov 0  }
   0x4   :  { %s1696_s27 = smov 0   ;;  %s1698_s28 = smov 0  }
   0x5   :  { %s1700_s29 = smov 0   ;;  %s1702_s30 = smov 0  }
   0x6 LB: > { %1962 = sst [smem:[#allocation14_spill]] %s1593_s27  ;;  %s1247_s14 = sadd.s32 4294967295, %s1605_s30   ;;  %s1605_s30 = sphi %s1702_s30, %s28_s30   ;;  %s1601_s29 = sphi %s1700_s29, %s1975_s29   ;;  %s1597_s28 = sphi %s1698_s28, %s1974_s28   ;;  %s1593_s27 = sphi %s1696_s27, %s1973_s27   ;;  %s1589_s26 = sphi %s1694_s26, %s1977_s26   ;;  %s1585_s25 = sphi %s1692_s25, %s1976_s25  }
   0x7   : > { %1963 = sst [smem:[#allocation15_spill]] %s1601_s29  ;;  %s1248_s15 = sadd.s32 4294967294, %s1605_s30  }
   0x8   : > { %s40_s16 = sadd.s32 1, %s1601_s29  ;;  %s327_s17 = sadd.s32 1, %s1593_s27 }
   0x9   : > { %p42_p0 = scmp.ge.s32.totalorder %s40_s16, 2  ;;  %p337_p1 = scmp.ne.s32.totalorder %s1593_s27, %s1589_s26 }
   0xa   : > { %p338_p2 = scmp.eq.s32.totalorder %s1247_s14, 1  ;;  %p343_p3 = scmp.ne.s32.totalorder %s1589_s26, %s1585_s25 }
   0xb   : > { %s1979_s16 = smov (%p42_p0, %s40_s16), 0  ;;  %p344_p5 = scmp.eq.s32.totalorder %s1248_s15, 1 }
   0xc   : > { %1964 = sst [smem:[#allocation16_spill]] %s1979_s16  ;;  %p1732_p4 = por %p338_p2, %p337_p1 }
   0xd   : > { %s322_s19 = ssub.s32 %s1601_s29, %s1979_s16  ;;  %p1249_p6 = scmp.ge.s32.totalorder %s1605_s30, 1 }
   0xe   : > { %p325_p7 = scmp.eq.s32.totalorder %s322_s19, 0  ;;  %p1739_p8 = por %p344_p5, %p343_p3 }
   0xf   : > { %p351_p9 = scmp.lt.s32.totalorder %s1605_s30, 3  ;;  %p1751_p11 = scmp.eq.s32.totalorder %s1247_s14, 0 }
  0x10   : > { %s1966_s20 = scalar_select %p1739_p8, 1, 0 }
  0x11   : > { %s1745_s21 = scalar_select %p325_p7, %s1593_s27, %s327_s17  }
  0x12   : > { %1967 = sst [smem:[#allocation17_spill]] %s1966_s20  ;;  %p1747_p10 = pnand %p1249_p6, %p351_p9 }
  0x13   : > { %1968 = sst [smem:[#allocation18_spill]] %s1745_s21  ;;  %s363_s19 = sshll.u32 %s1945_s1, 4  ;;  %s364_s19 = int_to_ptr.hbm [resolvable:$true] %s363_s19 }
  0x14   : > { %p1346_p12 = pneg %p1747_p10  ;;  %s1607_s16 = smov [#allocation5]  }
  0x15   : > { %s365_s17 = sshll.u32 %s1607_s16, 4  ;;  %s395_s27 = sshll.u32 %s1953_s9, 4  ;;  %s366_s17 = int_to_ptr.vmem [resolvable:$true] %s365_s17  ;;  %s396_s27 = int_to_ptr.hbm [resolvable:$true] %s395_s27 }
  0x16   : > { %p1347_p13 = pnand %p1751_p11, %p1346_p12  ;;  %s1608_s14 = smov [#allocation8]  }
  0x17   : > { %s397_s20 = sshll.u32 %s1608_s14, 4  ;;  %s1609_s24 = smov 64   ;;  %s398_s20 = int_to_ptr.vmem [resolvable:$true] %s397_s20 }
  0x18   : > { %1349 = dma.hbm_to_vmem [thread:$0]  (!%p1347_p13), %s364_s19, 16, %s366_s17, [#allocation6]  }
  0x19   : > { %s1610_s15 = smov 4   ;;  %429 = sbr.rel (%p1747_p10) target bundleno = 1927 (0x787), region = 72 }
  0x1a   : > { %1352 = dma.hbm_to_vmem [thread:$0]  (!%p1347_p13), %s396_s27, 256, %s398_s20, [#allocation9], %s1609_s24, %s1609_s24, %s1610_s15  }
  0x1e   : > { %1572 = dma.done.wait (%p1751_p11), [#allocation6], 16  }
  0x1f   : > { %1574 = vsyncadd (%p1751_p11), [#allocation6], 4294967280 }
  0x20   : > { %1576 = dma.done.wait (%p1751_p11), [#allocation9], 256  }
  0x21   : > { %1578 = vsyncadd (%p1751_p11), [#allocation9], 4294967040  ;;  %p478_p0 = scmp.lt.s32.totalorder %s1597_s28, 1  ;;  %vm495_vm0 = vcmask 261120   ;;  %v1611_v2 = vmov 32.0   ;;  %v1327_v5 = vld [vmem:[%s1947_s3 + $0x8] sm:$0xff] }
  0x22   : > { %1433 = vrcp.f32 %v1611_v2  ;;  %s1612_s19 = smov 96   ;;  %v1325_v8 = vld [vmem:[%s1947_s3] sm:$0xff]  ;;  %v1326_v23 = vld [vmem:[%s1947_s3 + $0x8] sm:$0xff]  ;;  %vm572_vm8 = vcmask 60416   ;;  %s1613_s23 = smov 112   ;;  %vm701_vm9 = vcmask 64512  }
  0x23   : > { %s479_s29 = scalar_select %p478_p0, %s1597_s28, 1  ;;  %548 = vrot.lane.b32.xlu2 %v1327_v5, %s1612_s19  ;;  %675 = vmatpush.bf16.msra.mxu1 %v1326_v23  ;;  %v1324_v25 = vld [vmem:[%s1947_s3] sm:$0xff]  ;;  %vm833_vm10 = vcmask 1043456   ;;  %vm915_vm11 = vcmask 126016   ;;  %vm922_vm12 = vcmask 191616   ;;  %vm929_vm13 = vcmask 257216  }
  0x24   : > { %v1427_v28 = vld [vmem:[%s1948_s4] ss:$0 sm:$0xff]  ;;  %v1425_v40 = vld [vmem:[#allocation5] ss:$0 sm:$0xff]  ;;  %s1614_s17 = smov 120   ;;  %s1615_s14 = smov 104  }
  0x25   : > { %s1257_s27 = sshll.u32 %s479_s29, 3  ;;  %v1426_v44 = vld [vmem:[%s1946_s2] ss:$0 sm:$0xff]  ;;  %s1616_s24 = smov 88  }
  0x26   : > { %s481_s21 = scalar_lea.vmem %s1944_s0, %s1257_s27  ;;  %s1617_s15 = smov 80  }
  0x27   : > { %v1780_v0 = vld [vmem:[%s481_s21] sm:$0xff]  ;;  %676 = vmatpush.bf16.msra.mxu1 %v1324_v25  ;;  %s1619_s29 = smov 16   ;;  %s1620_s27 = smov 8  }
  0x28   : > { %v496_v1 = vsel %vm495_vm0, %v1780_v0, 0.0  ;;  %v1434_v3 = vpop.eup %1433  ;;  %s1621_s16 = smov 24  }
  0x29   : > { %497 = vadd.xlane.f32.xlu0 %v496_v1  ;;  %v500_v4 = vmul.f32 32.0, %v1434_v3  ;;  %vm504_vm1 = vweird.f32 %v1434_v3 }
  0x2b   : > { %v501_v6 = vsub.f32 1.0, %v500_v4  ;;  %546 = vrot.lane.b32.xlu2 %v1325_v8, %s1612_s19 }
  0x2d   : > { %v502_v7 = vmul.f32 %v1434_v3, %v501_v6 }
  0x2f   : > { %v503_v9 = vadd.f32 %v1434_v3, %v502_v7 }
  0x31   : > { %614 = vadd.xlane.f32.xlu0 %v496_v1  ;;  %v1792_v10 = vsel %vm504_vm1, %v1434_v3, %v503_v9 }
  0x45   : > { %552 = vrot.lane.b32.xlu0 %v1427_v28, %s1612_s19 }
  0x7d   : > { %v549_v21 = vpop.permute.xlu2 %548 }
  0x7e   : > { %564 = vmatpush.bf16.msra.mxu0 %v549_v21 }
  0x85   : > { %v547_v22 = vpop.permute.xlu2 %546 }
  0x86   : > { %565 = vmatpush.bf16.msra.mxu0 %v547_v22 }
  0x9c   : > { %v498_v11 = vpop.xlane.xlu0 %497 }
  0x9d   : > { %v506_v12 = vmul.f32 %v1792_v10, %v498_v11 }
  0x9f   : > { %v507_v13 = vsub.f32 %v1780_v0, %v506_v12 }
  0xa1   : > { %v508_v14 = vmul.f32 %v507_v13, %v507_v13 }
  0xa3   : > { %v509_v15 = vsel %vm495_vm0, %v508_v14, 0.0 }
  0xa4   : > { %510 = vadd.xlane.f32.xlu1 %v509_v15  ;;  %v615_v16 = vpop.xlane.xlu0 %614 }
  0xa5   : > { %v623_v17 = vmul.f32 %v615_v16, %v1792_v10 }
  0xa7   : > { %v624_v18 = vsub.f32 %v1780_v0, %v623_v17 }
  0xa9   : > { %v625_v19 = vmul.f32 %v624_v18, %v624_v18 }
  0xab   : > { %v626_v20 = vsel %vm495_vm0, %v625_v19, 0.0 }
  0xac   : > { %627 = vadd.xlane.f32.xlu1 %v626_v20 }
  0xb7   : > { %v553_v56 = vpop.permute.xlu0 %552 }
 0x117   : > { %v511_v24 = vpop.xlane.xlu1 %510 }
 0x118   : > { %v512_v26 = vmul.f32 %v511_v24, %v1792_v10 }
 0x11a   : > { %v513_v27 = vadd.f32 1e-05, %v512_v26 }
 0x11c   : > { %1435 = vrsqrt.f32 %v513_v27  ;;  %vm520_vm3 = vweird.f32 %v513_v27 }
 0x11f   : > { %v628_v29 = vpop.xlane.xlu1 %627 }
 0x120   : > { %v629_v30 = vmul.f32 %v628_v29, %v1792_v10 }
 0x122   : > { %v1436_v31 = vpop.eup %1435  ;;  %v630_v32 = vadd.f32 1e-05, %v629_v30 }
 0x123   : > { %v515_v33 = vmul.f32 %v1436_v31, %v513_v27  ;;  %vm521_vm2 = vweird.f32 %v1436_v31 }
 0x124   : > { %1437 = vrsqrt.f32 %v630_v32  ;;  %vm522_vm4 = vmor %vm520_vm3, %vm521_vm2  ;;  %vm637_vm6 = vweird.f32 %v630_v32 }
 0x125   : > { %v516_v34 = vmul.f32 %v1436_v31, %v515_v33 }
 0x127   : > { %v517_v35 = vmul.f32 0.5, %v516_v34 }
 0x129   : > { %v518_v36 = vsub.f32 1.5, %v517_v35 }
 0x12a   : > { %v1438_v37 = vpop.eup %1437 }
 0x12b   : > { %v519_v38 = vmul.f32 %v1436_v31, %v518_v36  ;;  %v632_v39 = vmul.f32 %v1438_v37, %v630_v32  ;;  %vm638_vm5 = vweird.f32 %v1438_v37 }
 0x12c   : > { %vm639_vm7 = vmor %vm637_vm6, %vm638_vm5  ;;  %vm1119_vm6 = vcmask 523264  }
 0x12d   : > { %v523_v41 = vsel %vm522_vm4, %v1436_v31, %v519_v38  ;;  %v633_v42 = vmul.f32 %v1438_v37, %v632_v39 }
 0x12e   : > { %v524_v43 = vmul.f32 %v523_v41, %v507_v13 }
 0x12f   : > { %v634_v45 = vmul.f32 0.5, %v633_v42 }
 0x130   : > { %v528_v46 = vmul.f32 %v1425_v40, %v524_v43 }
 0x131   : > { %v635_v47 = vsub.f32 1.5, %v634_v45 }
 0x132   : > { %v532_v48 = vadd.f32 %v1426_v44, %v528_v46 }
 0x133   : > { %v636_v49 = vmul.f32 %v1438_v37, %v635_v47 }
 0x134   : > { %v533_v50 = vpack.c.bf16 %v532_v48, %v532_v48 }
 0x135   : > { %v640_v51 = vsel %vm639_vm7, %v1438_v37, %v636_v49 }
 0x136   : > { %1266 = vmatmul.msk.bf16.vlgmr.msra.gmra.mxu0 %vm495_vm0, %v533_v50  ;;  %v641_v52 = vmul.f32 %v640_v51, %v624_v18 }
 0x138   : > { %v645_v53 = vmul.f32 %v1425_v40, %v641_v52 }
 0x13a   : > { %v649_v54 = vadd.f32 %v1426_v44, %v645_v53 }
 0x13c   : > { %v650_v55 = vpack.c.bf16 %v649_v54, %v649_v54 }
 0x13e   : > { %1275 = vmatmul.msk.bf16.vlgmr.msra.gmra.mxu1 %vm495_vm0, %v650_v55 }
 0x1b3   : > { %v567_v57 = vpop.f32.mrf.mxu0 }
 0x1b4   : > { %v568_v58 = vadd.f32 %v567_v57, %v553_v56 }
 0x1b6   : > { %v1817_v59 = vpack.c.bf16 %v568_v58, %v568_v58 }
 0x1b8   : > { %589 = vrot.lane.b32.xlu2 %v1817_v59, %s1613_s23  ;;  %579 = vrot.lane.b32.xlu1 %v1817_v59, %s1614_s17  ;;  %573 = vst.msk [vmem:[#allocation2] sm:$0xf] %vm572_vm8, %v1817_v59 }
 0x1bb   : > { %v569_v60 = vpop.f32.mrf.mxu0  ;;  %v678_v61 = vpop.f32.mrf.mxu1 }
 0x1bc   : > { %v679_v62 = vadd.f32 %v1427_v28, %v678_v61 }
 0x1be   : > { %v682_v63 = vmul.f32 0.35355338, %v679_v62 }
 0x1bf   : > { %v697_v1 = vld [vmem:[#allocation2] sm:$0xf] }
 0x1c0   : > { %599 = vrot.lane.b32.xlu2 %v1817_v59, %s1615_s14  ;;  %687 = vrot.lane.b32.xlu0 %v682_v63, %s1613_s23  ;;  %v706_v2 = vsel %vm701_vm9, %v697_v1, 0  ;;  %v693_v4 = vpack.c.bf16 %v682_v63, %v682_v63 }
 0x1c1   : > { %715 = vmatpush.bf16.xpose.msra.mxu2 %v706_v2 }
 0x1c3   : > { %v680_v3 = vpop.f32.mrf.mxu1 }
 0x1c8   : > { %684 = vrot.lane.b32.xlu2 %v682_v63, %s1614_s17  ;;  %1276 = vmatmul.msk.bf16.vlgmr.msra.gmra.mxu2 %vm701_vm9, %v693_v4 }
 0x1d0   : > { %690 = vrot.lane.b32.xlu2 %v682_v63, %s1615_s14 }
 0x212   : > { %v590_v5 = vpop.permute.xlu2 %589 }
 0x213   : > { %593 = vst.msk [vmem:[#allocation2 + $0x8] sm:$0xf] %vm572_vm8, %v590_v5 }
 0x21a   : > { %v600_v6 = vpop.permute.xlu2 %599  ;;  %v699_v7 = vld [vmem:[#allocation2 + $0x8] sm:$0xf] }
 0x21b   : > { %603 = vst.msk [vmem:[#allocation2 + $0xc] sm:$0xf] %vm572_vm8, %v600_v6  ;;  %v744_v8 = vsel %vm701_vm9, %v699_v7, 0 }
 0x21c   : > { %753 = vmatpush.bf16.xpose.msrb.mxu0 %v744_v8 }
 0x222   : > { %v685_v9 = vpop.permute.xlu2 %684  ;;  %v700_v11 = vld [vmem:[#allocation2 + $0xc] sm:$0xf] }
 0x223   : > { %v763_v12 = vsel %vm701_vm9, %v700_v11, 0  ;;  %v694_v20 = vpack.c.bf16 %v685_v9, %v685_v9 }
 0x224   : > { %772 = vmatpush.bf16.xpose.msrb.mxu1 %v763_v12 }
 0x22a   : > { %v580_v13 = vpop.permute.xlu1 %579  ;;  %v691_v14 = vpop.permute.xlu2 %690 }
 0x22b   : > { %583 = vst.msk [vmem:[#allocation2 + $0x4] sm:$0xf] %vm572_vm8, %v580_v13  ;;  %v696_v15 = vpack.c.bf16 %v691_v14, %v691_v14 }
 0x22d   : > { %1279 = vmatmul.msk.bf16.vlgmr.msrb.gmra.mxu1 %vm701_vm9, %v696_v15 }
 0x232   : > { %v688_v16 = vpop.permute.xlu0 %687  ;;  %v698_v17 = vld [vmem:[#allocation2 + $0x4] sm:$0xf] }
 0x233   : > { %v695_v18 = vpack.c.bf16 %v688_v16, %v688_v16  ;;  %v725_v19 = vsel %vm701_vm9, %v698_v17, 0 }
 0x234   : > { %734 = vmatpush.bf16.xpose.msra.mxu3 %v725_v19 }
 0x235   : > { %1278 = vmatmul.msk.bf16.vlgmr.msrb.gmra.mxu0 %vm701_vm9, %v695_v18 }
 0x23b   : > { %1277 = vmatmul.msk.bf16.vlgmr.msra.gmra.mxu3 %vm701_vm9, %v694_v20 }
 0x24b   : > { %v717_v21 = vpop.f32.mrf.mxu2 }
 0x24c   : > { %v778_v32 = vsel %vm701_vm9, %v717_v21, -inf }
 0x253   : > { %v719_v22 = vpop.f32.mrf.mxu2 }
 0x2aa   : > { %v774_v23 = vpop.f32.mrf.mxu1 }
 0x2ab   : > { %v787_v24 = vsel %vm701_vm9, %v774_v23, -inf }
 0x2ac   : > { %788 = vmax.xlane.f32.xlu2 %v787_v24 }
 0x2b2   : > { %v755_v25 = vpop.f32.mrf.mxu0  ;;  %v776_v26 = vpop.f32.mrf.mxu1 }
 0x2b3   : > { %v784_v27 = vsel %vm701_vm9, %v755_v25, -inf }
 0x2b4   : > { %785 = vmax.xlane.f32.xlu0 %v784_v27 }
 0x2ba   : > { %v757_v28 = vpop.f32.mrf.mxu0 }
 0x2be   : > { %v736_v29 = vpop.f32.mrf.mxu3 }
 0x2bf   : > { %v781_v30 = vsel %vm701_vm9, %v736_v29, -inf }
 0x2c0   : > { %782 = vmax.xlane.f32.xlu1 %v781_v30 }
 0x2c6   : > { %v738_v31 = vpop.f32.mrf.mxu3 }
 0x2c7   : > { %v1329_v31 = vld [vmem:[%s1949_s5 + $0x8] sm:$0xff] }
 0x2c8   : > { %584 = vrot.lane.b32.xlu0 %v1817_v59, %s1616_s24  ;;  %779 = vmax.xlane.f32.xlu1 %v778_v32  ;;  %v1328_v32 = vld [vmem:[%s1949_s5] sm:$0xff] }
 0x2e1   : > { %594 = vrot.lane.b32.xlu1 %v1817_v59, %s1617_s15 }
 0x2e9   : > { %575 = vrot.lane.b32.xlu1 %v1817_v59, %s1612_s19  ;;  %s1618_s19 = smov 72  }
 0x31f   : > { %v789_v33 = vpop.xlane.xlu2 %788 }
 0x320   : > { %v793_v34 = vsub.f32 %v774_v23, %v789_v33 }
 0x322   : > { %v800_v35 = vmul.f32 1.442695, %v793_v34 }
 0x324   : > { %1439 = vpow2.f32 %v800_v35 }
 0x327   : > { %v786_v36 = vpop.xlane.xlu0 %785 }
 0x328   : > { %v792_v37 = vsub.f32 %v755_v25, %v786_v36 }
 0x32a   : > { %v1440_v38 = vpop.eup %1439  ;;  %v798_v39 = vmul.f32 1.442695, %v792_v37  ;;  %v1428_v37 = vld [vmem:[%s1950_s6] ss:$0 sm:$0xff] }
 0x32b   : > { %v811_v40 = vsel %vm701_vm9, %v1440_v38, 0.0 }
 0x32c   : > { %1441 = vpow2.f32 %v798_v39  ;;  %812 = vadd.xlane.f32.xlu0 %v811_v40 }
 0x332   : > { %v1442_v41 = vpop.eup %1441 }
 0x333   : > { %v783_v42 = vpop.xlane.xlu1 %782  ;;  %v808_v43 = vsel %vm701_vm9, %v1442_v41, 0.0 }
 0x334   : > { %v791_v44 = vsub.f32 %v736_v29, %v783_v42  ;;  %809 = vadd.xlane.f32.xlu2 %v808_v43 }
 0x336   : > { %v796_v45 = vmul.f32 1.442695, %v791_v44 }
 0x338   : > { %1443 = vpow2.f32 %v796_v45 }
 0x33a   : > { %v585_v46 = vpop.permute.xlu0 %584 }
 0x33b   : > { %588 = vst.msk [vmem:[#allocation3 + $0x4] sm:$0xf] %vm572_vm8, %v585_v46  ;;  %v780_v47 = vpop.xlane.xlu1 %779 }
 0x33c   : > { %v790_v48 = vsub.f32 %v717_v21, %v780_v47 }
 0x33e   : > { %v1444_v49 = vpop.eup %1443  ;;  %v794_v50 = vmul.f32 1.442695, %v790_v48  ;;  %v1331_v48 = vld [vmem:[#allocation8 + $0x8] sm:$0xff] }
 0x33f   : > { %v805_v51 = vsel %vm701_vm9, %v1444_v49, 0.0 }
 0x340   : > { %1445 = vpow2.f32 %v794_v50  ;;  %806 = vadd.xlane.f32.xlu2 %v805_v51 }
 0x342   : > { %v827_v52 = vld [vmem:[#allocation3 + $0x4] sm:$0xf] }
 0x343   : > { %v854_v53 = vsel %vm833_vm10, %v827_v52, 0 }
 0x344   : > { %863 = vmatpush.bf16.msrb.mxu3 %v854_v53 }
 0x346   : > { %v1446_v54 = vpop.eup %1445 }
 0x347   : > { %v802_v55 = vsel %vm701_vm9, %v1446_v54, 0.0 }
 0x348   : > { %803 = vadd.xlane.f32.xlu1 %v802_v55  ;;  %1031 = vmatpush.bf16.msra.mxu3 %v1331_v48 }
 0x353   : > { %v595_v56 = vpop.permute.xlu1 %594 }
 0x354   : > { %598 = vst.msk [vmem:[#allocation3 + $0x8] sm:$0xf] %vm572_vm8, %v595_v56 }
 0x358   : > { %604 = vrot.lane.b32.xlu2 %v1817_v59, %s1618_s19  ;;  %s475_s19 = sand.u32 1, %s1589_s26  }
 0x35b   : > { %v576_v57 = vpop.permute.xlu1 %575  ;;  %v828_v58 = vld [vmem:[#allocation3 + $0x8] sm:$0xf] }
 0x35c   : > { %578 = vst.msk [vmem:[#allocation3] sm:$0xf] %vm572_vm8, %v576_v57  ;;  %v873_v60 = vsel %vm833_vm10, %v828_v58, 0  ;;  %v1429_v58 = vld [vmem:[%s1951_s7] ss:$0 sm:$0xff] }
 0x35d   : > { %882 = vmatpush.bf16.msra.mxu0 %v873_v60 }
 0x363   : > { %v826_v61 = vld [vmem:[#allocation3] sm:$0xf] }
 0x364   : > { %v835_v62 = vsel %vm833_vm10, %v826_v61, 0 }
 0x365   : > { %844 = vmatpush.bf16.msrb.mxu2 %v835_v62 }
 0x369   : > { %961 = vmatpush.bf16.msra.mxu2 %v1329_v31 }
 0x36d   : > { %962 = vmatpush.bf16.msra.mxu2 %v1328_v32 }
 0x39f   : > { %v813_v59 = vpop.xlane.xlu0 %812 }
 0x3a7   : > { %v810_v63 = vpop.xlane.xlu2 %809 }
 0x3a8   : > { %1447 = vrcp.f32 %v810_v63 }
 0x3ae   : > { %v1448_v1 = vpop.eup %1447 }
 0x3af   : > { %v820_v2 = vmul.f32 %v1448_v1, %v1442_v41 }
 0x3b1   : > { %v824_v3 = vpack.c.bf16 %v820_v2, %v820_v2  ;;  %v1431_v2 = vld [vmem:[%s1954_s10] ss:$0 sm:$0xff] }
 0x3b3   : > { %v807_v4 = vpop.xlane.xlu2 %806  ;;  %1282 = vmatmul.msk.bf16.vlgmr.msra.gmra.mxu0 %vm701_vm9, %v824_v3 }
 0x3b4   : > { %1449 = vrcp.f32 %v807_v4 }
 0x3b5   : > { %1451 = vrcp.f32 %v813_v59 }
 0x3ba   : > { %v1450_v5 = vpop.eup %1449 }
 0x3bb   : > { %v819_v6 = vmul.f32 %v1450_v5, %v1444_v49  ;;  %v605_v7 = vpop.permute.xlu2 %604  ;;  %v804_v8 = vpop.xlane.xlu1 %803  ;;  %v1330_v49 = vld [vmem:[#allocation8] sm:$0xff] }
 0x3bc   : > { %608 = vst.msk [vmem:[#allocation3 + $0xc] sm:$0xf] %vm572_vm8, %v605_v7  ;;  %1453 = vrcp.f32 %v804_v8  ;;  %v1452_v11 = vpop.eup %1451  ;;  %1032 = vmatpush.bf16.msra.mxu3 %v1330_v49  ;;  %v1335_v8 = vld [vmem:[%s1955_s11 + $0x18] sm:$0xff] }
 0x3bd   : > { %v823_v9 = vpack.c.bf16 %v819_v6, %v819_v6  ;;  %v821_v13 = vmul.f32 %v1452_v11, %v1440_v38  ;;  %1127 = vmatpush.bf16.msrb.mxu0 %v1335_v8 }
 0x3bf   : > { %1281 = vmatmul.msk.bf16.vlgmr.msrb.gmra.mxu3 %vm701_vm9, %v823_v9  ;;  %v825_v18 = vpack.c.bf16 %v821_v13, %v821_v13 }
 0x3c2   : > { %v1454_v12 = vpop.eup %1453 }
 0x3c3   : > { %v818_v14 = vmul.f32 %v1454_v12, %v1446_v54  ;;  %v829_v15 = vld [vmem:[#allocation3 + $0xc] sm:$0xf] }
 0x3c4   : > { %v892_v16 = vsel %vm833_vm10, %v829_v15, 0 }
 0x3c5   : > { %v822_v17 = vpack.c.bf16 %v818_v14, %v818_v14  ;;  %901 = vmatpush.bf16.msra.mxu1 %v892_v16  ;;  %v1334_v14 = vld [vmem:[%s1955_s11 + $0x10] sm:$0xff] }
 0x3c6   : > { %1128 = vmatpush.bf16.msrb.mxu0 %v1334_v14 }
 0x3c7   : > { %1280 = vmatmul.msk.bf16.vlgmr.msrb.gmra.mxu2 %vm701_vm9, %v822_v17 }
 0x3c8   : > { %1283 = vmatmul.msk.bf16.vlgmr.msra.gmra.mxu1 %vm701_vm9, %v825_v18 }
 0x430   : > { %v884_v19 = vpop.f32.mrf.mxu0 }
 0x431   : > { %v917_v20 = vpack.c.bf16 %v884_v19, %v884_v19  ;;  %v1333_v19 = vld [vmem:[%s1955_s11 + $0x8] sm:$0xff] }
 0x432   : > { %1129 = vmatpush.bf16.msrb.mxu0 %v1333_v19 }
 0x433   : > { %919 = vrot.lane.b32.xlu2 %v917_v20, %s1619_s29  ;;  %s1256_s29 = sshll.u32 %s475_s19, 3 }
 0x434   : > { %s477_s17 = scalar_lea.vmem [#allocation10], %s1256_s29  ;;  %s1539_s29 = scalar_lea.hbm %s1957_s13, 16 }
 0x435   : > { %s1152_s14 = sshll.u32 %s477_s17, 4  ;;  %s1153_s14 = int_to_ptr.vmem [resolvable:$true] %s1152_s14 }
 0x438   : > { %v886_v21 = vpop.f32.mrf.mxu0 }
 0x442   : > { %v865_v22 = vpop.f32.mrf.mxu3 }
 0x443   : > { %v910_v23 = vpack.c.bf16 %v865_v22, %v865_v22 }
 0x445   : > { %v903_v24 = vpop.f32.mrf.mxu1  ;;  %912 = vrot.lane.b32.xlu2 %v910_v23, %s1620_s27  ;;  %v1332_v23 = vld [vmem:[%s1955_s11] sm:$0xff]  ;;  %s1321_s27 = sshll.u32 %s1597_s28, 3  ;;  %s1139_s28 = scalar_lea.sflag [#allocation7], %s475_s19 }
 0x446   : > { %v924_v27 = vpack.c.bf16 %v903_v24, %v903_v24  ;;  %1130 = vmatpush.bf16.msrb.mxu0 %v1332_v23  ;;  %s1150_s23 = scalar_lea.hbm %s1957_s13, %s1321_s27 }
 0x447   : > { %s1154_s24 = sshll.u32 %s1150_s23, 4  ;;  %s1155_s24 = int_to_ptr.hbm [resolvable:$true] %s1154_s24 }
 0x448   : > { %s1533_s15 = sshra.s32 %s1155_s24, 4  ;;  %s1534_s15 = int_to_ptr.hbm [resolvable:$true] %s1533_s15 }
 0x449   : > { %p1540_p5 = scmp.lt.s32.totalorder %s1534_s15, %s1957_s13 }
 0x44a   : > { %v846_v25 = vpop.f32.mrf.mxu2  ;;  %v867_v26 = vpop.f32.mrf.mxu3 }
 0x44b   : > { %v907_v28 = vpack.c.bf16 %v846_v25, %v846_v25 }
 0x44d   : > { %909 = vst.msk [vmem:[#allocation4] sm:$0xf] %vm572_vm8, %v907_v28  ;;  %v905_v29 = vpop.f32.mrf.mxu1  ;;  %926 = vrot.lane.b32.xlu2 %v924_v27, %s1621_s16  ;;  %s1535_s16 = scalar_lea.hbm %s1534_s15, 8 }
 0x44e   : > { %p1536_p1 = scmp.ne.s32.totalorder %s1534_s15, %s1535_s16  ;;  %p1541_p6 = scmp.lt.s32.totalorder %s1539_s29, %s1535_s16 }
 0x450   : > { %p1537_p2 = pnand %p1536_p1, %p1732_p4  ;;  %p1542_p7 = por %p1541_p6, %p1540_p5 }
 0x452   : > { %v848_v30 = vpop.f32.mrf.mxu2  ;;  %p1538_p3 = pneg %p1537_p2 }
 0x454   : > { %p1543_p9 = pnand %p1542_p7, %p1538_p3 }
 0x48d   : > { %v920_v33 = vpop.permute.xlu2 %919 }
 0x49f   : > { %v913_v34 = vpop.permute.xlu2 %912 }
 0x4a0   : > { %916 = vst.msk [vmem:[#allocation4] sm:$0xf] %vm915_vm11, %v913_v34 }
 0x4a1   : > { %923 = vst.msk [vmem:[#allocation4] sm:$0xf] %vm922_vm12, %v920_v33 }
 0x4a7   : > { %v927_v35 = vpop.permute.xlu2 %926 }
 0x4a8   : > { %930 = vst.msk [vmem:[#allocation4] sm:$0xf] %vm929_vm13, %v927_v35 }
 0x4af   : > { %v931_v36 = vld [vmem:[#allocation4] sm:$0xf] }
 0x4b0   : > { %1292 = vmatmul.msk.bf16.vlgmr.msra.gmra.mxu2 %vm495_vm0, %v931_v36 }
 0x533   : > { %v964_v38 = vpop.f32.mrf.mxu2 }
 0x534   : > { %v965_v39 = vadd.f32 %v1428_v37, %v964_v38 }
 0x536   : > { %v1872_v40 = vadd.f32 %v965_v39, %v1780_v0 }
 0x538   : > { %v971_v41 = vsel %vm495_vm0, %v1872_v40, 0.0 }
 0x539   : > { %972 = vadd.xlane.f32.xlu0 %v971_v41 }
 0x53b   : > { %v966_v42 = vpop.f32.mrf.mxu2 }
 0x5ac   : > { %v973_v43 = vpop.xlane.xlu0 %972 }
 0x5ad   : > { %v974_v44 = vmul.f32 %v973_v43, %v1792_v10 }
 0x5af   : > { %v975_v45 = vsub.f32 %v1872_v40, %v974_v44 }
 0x5b1   : > { %v976_v46 = vmul.f32 %v975_v45, %v975_v45 }
 0x5b3   : > { %v977_v47 = vsel %vm495_vm0, %v976_v46, 0.0 }
 0x5b4   : > { %978 = vadd.xlane.f32.xlu2 %v977_v47 }
 0x627   : > { %v979_v0 = vpop.xlane.xlu2 %978 }
 0x628   : > { %v980_v50 = vmul.f32 %v979_v0, %v1792_v10  ;;  %v1430_v10 = vld [vmem:[%s1952_s8] ss:$0 sm:$0xff] }
 0x62a   : > { %v981_v51 = vadd.f32 1e-05, %v980_v50  ;;  %v1432_v50 = vld [vmem:[%s1956_s12] ss:$0 sm:$0xff] }
 0x62c   : > { %1455 = vrsqrt.f32 %v981_v51  ;;  %vm988_vm15 = vweird.f32 %v981_v51 }
 0x632   : > { %v1456_v52 = vpop.eup %1455 }
 0x633   : > { %v983_v53 = vmul.f32 %v1456_v52, %v981_v51  ;;  %vm989_vm14 = vweird.f32 %v1456_v52 }
 0x634   : > { %vm990_vm1 = vmor %vm988_vm15, %vm989_vm14 }
 0x635   : > { %v984_v54 = vmul.f32 %v1456_v52, %v983_v53 }
 0x637   : > { %v985_v55 = vmul.f32 0.5, %v984_v54 }
 0x639   : > { %v986_v56 = vsub.f32 1.5, %v985_v55 }
 0x63b   : > { %v987_v57 = vmul.f32 %v1456_v52, %v986_v56 }
 0x63d   : > { %v991_v60 = vsel %vm990_vm1, %v1456_v52, %v987_v57 }
 0x63e   : > { %v992_v61 = vmul.f32 %v991_v60, %v975_v45 }
 0x640   : > { %v996_v62 = vmul.f32 %v1429_v58, %v992_v61 }
 0x642   : > { %v1000_v63 = vadd.f32 %v1430_v10, %v996_v62 }
 0x644   : > { %v1001_v1 = vpack.c.bf16 %v1000_v63, %v1000_v63 }
 0x646   : > { %1301 = vmatmul.msk.bf16.vlgmr.msra.gmra.mxu3 %vm495_vm0, %v1001_v1 }
 0x6c9   : > { %v1034_v3 = vpop.f32.mrf.mxu3 }
 0x6ca   : > { %v1035_v4 = vadd.f32 %v1431_v2, %v1034_v3 }
 0x6cc   : > { %v1039_v59 = vmul.f32 0.70710677, %v1035_v4  ;;  %v1038_v47 = vmul.f32 0.5, %v1035_v4 }
 0x6ce   : > { %v1040_v5 = vmul.f32 %v1039_v59, %v1039_v59 }
 0x6d0   : > { %v1041_v6 = vmin.f32 %v1040_v5, 16.0 }
 0x6d1   : > { %v1036_v7 = vpop.f32.mrf.mxu3 }
 0x6d2   : > { %v1042_v9 = vmul.f32 2.1237322e-06, %v1041_v6  ;;  %v1053_v11 = vmul.f32 3.8918573e-05, %v1041_v6 }
 0x6d4   : > { %v1043_v12 = vadd.f32 0.00028619796, %v1042_v9  ;;  %v1054_v13 = vadd.f32 0.001143296, %v1053_v11 }
 0x6d6   : > { %v1044_v15 = vmul.f32 %v1043_v12, %v1041_v6  ;;  %v1055_v16 = vmul.f32 %v1054_v13, %v1041_v6 }
 0x6d8   : > { %v1056_v17 = vadd.f32 0.014752088, %v1055_v16  ;;  %v1045_v18 = vadd.f32 0.0036580483, %v1044_v15 }
 0x6da   : > { %v1057_v20 = vmul.f32 %v1056_v17, %v1041_v6  ;;  %v1046_v22 = vmul.f32 %v1045_v18, %v1041_v6 }
 0x6dc   : > { %v1058_v21 = vadd.f32 0.112945676, %v1057_v20  ;;  %v1047_v26 = vadd.f32 0.05243302, %v1046_v22 }
 0x6de   : > { %v1059_v24 = vmul.f32 %v1058_v21, %v1041_v6  ;;  %v1048_v29 = vmul.f32 %v1047_v26, %v1041_v6 }
 0x6e0   : > { %v1060_v25 = vadd.f32 0.4994258, %v1059_v24  ;;  %v1049_v30 = vadd.f32 0.18741608, %v1048_v29 }
 0x6e2   : > { %v1061_v27 = vmul.f32 %v1060_v25, %v1041_v6  ;;  %v1050_v32 = vmul.f32 %v1049_v30, %v1041_v6 }
 0x6e4   : > { %v1062_v28 = vadd.f32 1.0, %v1061_v27  ;;  %v1051_v36 = vadd.f32 1.1283791, %v1050_v32 }
 0x6e6   : > { %1457 = vrcp.f32 %v1062_v28  ;;  %v1074_v35 = vand.u32 2147483648, %v1062_v28  ;;  %v1072_v38 = vand.u32 2147483647, %v1062_v28  ;;  %vm1068_vm3 = vweird.f32 %v1062_v28 }
 0x6e7   : > { %v1052_v42 = vmul.f32 %v1051_v36, %v1039_v59 }
 0x6e8   : > { %v1075_v41 = vor.u32 1.1754944e-38, %v1074_v35  ;;  %vm1073_vm5 = vcmp.eq.f32.partialorder %v1072_v38, 8.507059e+37 }
 0x6ec   : > { %v1458_v31 = vpop.eup %1457 }
 0x6ed   : > { %v1064_v33 = vmul.f32 %v1458_v31, %v1062_v28  ;;  %vm1069_vm2 = vweird.f32 %v1458_v31 }
 0x6ee   : > { %vm1070_vm4 = vmor %vm1068_vm3, %vm1069_vm2 }
 0x6ef   : > { %v1065_v34 = vsub.f32 1.0, %v1064_v33 }
 0x6f1   : > { %v1066_v37 = vmul.f32 %v1458_v31, %v1065_v34 }
 0x6f3   : > { %v1067_v39 = vadd.f32 %v1458_v31, %v1066_v37 }
 0x6f5   : > { %v1071_v43 = vsel %vm1070_vm4, %v1458_v31, %v1067_v39 }
 0x6f6   : > { %v1076_v44 = vsel %vm1073_vm5, %v1075_v41, %v1071_v43 }
 0x6f7   : > { %v1077_v45 = vmul.f32 %v1076_v44, %v1052_v42 }
 0x6f9   : > { %v1302_v46 = vclamps-f32 %v1077_v45, 1.0 }
 0x6fb   : > { %v1080_v48 = vadd.f32 1.0, %v1302_v46 }
 0x6fd   : > { %v1081_v49 = vmul.f32 %v1080_v48, %v1038_v47 }
 0x6ff   : > { %v1082_v0 = vpack.c.bf16 %v1081_v49, %v1081_v49 }
 0x701   : > { %1319 = vmatmul.msk.bf16.vlgmr.msrb.gmra.mxu0 %vm1119_vm6, %v1082_v0 }
 0x77e   : > { %v1132_v51 = vpop.f32.mrf.mxu0 }
 0x77f   : > { %v1133_v52 = vadd.f32 %v1432_v50, %v1132_v51 }
 0x781   : > { %v1136_v53 = vadd.f32 %v1133_v52, %v1872_v40 }
 0x783   : > { %1137 = vst.msk [vmem:[%s477_s17] sm:$0xff] %vm495_vm0, %v1136_v53 }
 0x784   : > { %1546 = shalt.err (!%p1543_p9)
}
 0x785   : > { %1344 = dma.vmem_to_hbm [thread:$0]  (%p1732_p4), %s1153_s14, 128, %s1155_s24, %s1139_s28  }
 0x786   : > { %v1134_v40 = vpop.f32.mrf.mxu0 }
 0x787 PF: > { %p1361_p10 = scmp.ge.s32.totalorder %s1605_s30, 2  ;;  %s1166_s23 = sand.u32 1, %s1585_s25  }
 0x788   : > { %s1167_s17 = scalar_lea.sflag [#allocation7], %s1166_s23 }
 0x789   : > { %p1354_p11 = pnand %p1361_p10, %p1739_p8 }
 0x78b   : > { %p1355_p12 = pneg %p1354_p11 }
 0x78d   : > { %1580 = dma.done.wait (%p1355_p12), %s1167_s17, 128  }
 0x78e   : > { %1582 = vsyncadd (%p1355_p12), %s1167_s17, 4294967168  ;;  %s28_s30 = sadd.s32 1, %s1605_s30   ;;  %s1972_s15 = sld [smem:[#allocation14_spill]] }
 0x78f   : > { %p25_p13 = scmp.ge.s32.totalorder %s28_s30, 4   ;;  %s1973_s27 = sld [smem:[#allocation18_spill]] }
 0x790   : > { %s1974_s28 = sld [smem:[#allocation15_spill]]  ;;  %s1976_s25 = smov %s1589_s26 }
 0x791   : > { %s1975_s29 = sld [smem:[#allocation16_spill]]  ;;  %27 = sbr.rel (!%p25_p13) target bundleno = 6 (0x6), region = 127 }
 0x794   : > { %s1977_s26 = smov %s1972_s15 }
 0x796   :  { %1173 = vsyncpa [#allocation6], 1 }
 0x797   :  { %1175 = vsyncpa [#allocation6 + $0x1], 1 }
 0x798   :  { %1176 = vsyncpa [#allocation9], 1 }
 0x799   :  { %1177 = vsyncpa [#allocation7], 1 }
 0x79a   :  { %1179 = vsyncpa [#allocation7 + $0x1], 1 }

</bundles_post_ra>
